<compile_context>
chip_gen: v5e
topology: v5e:2x2
jax: 0.10.0
libtpu: 0.0.40
codegen_flags: <defaults>
</compile_context>

<pallas_src>
import functools

import jax
import jax.numpy as jnp
from jax.experimental import pallas as pl
from jax.experimental.pallas import tpu as pltpu

_LANE = 128


def _wicket_loss_kernel(pw_ref, pred_ref, targ_ref, out_ref, acc_ref, pair_ref,
                        *, n_valid, n_cols):
    """Processes one (tile_rows, 128) slice of the flattened predictions/targets."""
    i = pl.program_id(0)

    @pl.when(i == 0)
    def _init():
        acc_ref[...] = jnp.zeros_like(acc_ref)
        pair_ref[...] = jnp.zeros_like(pair_ref)

    p = pred_ref[...].astype(jnp.float32)      # (tr, 128), upcast on-chip
    t = targ_ref[...].astype(jnp.float32)
    tr, n_lanes = p.shape

    pw = pw_ref[0, 0]                          # penalty weight (SMEM scalar)
    inv_bc = 1.0 / float(n_valid)              # 1 / (B * C)
    inv_b = float(n_cols) / float(n_valid)     # 1 / B

    # Validity mask vs. the un-padded flat length: handles both the wrapper's
    # zero padding and garbage rows of a ragged last grid tile.
    rows = jax.lax.broadcasted_iota(jnp.int32, (tr, n_lanes), 0) + i * tr
    lanes = jax.lax.broadcasted_iota(jnp.int32, (tr, n_lanes), 1)
    last_row = n_valid // n_lanes
    last_len = n_valid % n_lanes
    valid = (rows < last_row) | ((rows == last_row) & (lanes < last_len))

    # --- fused: 2 * MSE + penalty_weight * mean(relu(-pred)) -----------------
    d = p - t
    elem = (2.0 * inv_bc) * (d * d) + (pw * inv_bc) * jnp.maximum(-p, 0.0)
    acc_ref[...] += jnp.where(valid, elem, 0.0)

    # --- fused column penalties ----------------------------------------------
    # Because C divides 128, element at lane l has column (l % C), so a
    # "wickets" value (col 0) at lane l has its "bonus" (col 1) partner at
    # lane l + 1 of the same row.  Pair them with adjacent-lane slices.
    w = p[:, : n_lanes - 1]
    b = p[:, 1:]
    pair = jnp.maximum(b - w, 0.0) + 0.25 * jnp.maximum(-w * b, 0.0)
    wick = (lanes[:, : n_lanes - 1] % n_cols == 0) & valid[:, : n_lanes - 1]
    pair_ref[...] += jnp.where(wick, (pw * inv_b) * pair, 0.0)

    @pl.when(i == pl.num_programs(0) - 1)
    def _finalize():
        out_ref[0, 0] = jnp.sum(acc_ref[...]) + jnp.sum(pair_ref[...])


def wicket_loss(predictions, targets, penalty_weight=1.0, block_rows=4096):
    """predictions, targets: (B, C) with C >= 2 and 128 % C == 0. Returns scalar f32."""
    assert predictions.shape == targets.shape
    assert predictions.ndim == 2
    B, C = predictions.shape
    assert C >= 2
    if _LANE % C != 0:
        # TODO(synk): support C that does not divide 128 (wickets/bonus pairs
        # would straddle lane-row boundaries; needs a transposed (C, B) path).
        raise NotImplementedError("wicket_loss kernel requires 128 % C == 0")

    n = B * C
    pred_flat = predictions.reshape(n)         # metadata-only: (B, C) is contiguous
    targ_flat = targets.reshape(n)
    pad = (-n) % _LANE
    if pad:                                    # only copies when n % 128 != 0
        pred_flat = jnp.pad(pred_flat, (0, pad))
        targ_flat = jnp.pad(targ_flat, (0, pad))
    rows_total = (n + pad) // _LANE

    if rows_total <= block_rows:
        tr = rows_total                        # single tile == full extent
    else:
        tr = max(8, (block_rows // 8) * 8)     # keep (8, 128) sublane divisibility
    num_tiles = pl.cdiv(rows_total, tr)

    pred2d = pred_flat.reshape(rows_total, _LANE)
    targ2d = targ_flat.reshape(rows_total, _LANE)
    pw_arr = jnp.asarray(penalty_weight, dtype=jnp.float32).reshape(1, 1)

    kernel = functools.partial(_wicket_loss_kernel, n_valid=n, n_cols=C)
    bytes_accessed = (pred2d.size * pred2d.dtype.itemsize
                      + targ2d.size * targ2d.dtype.itemsize + 8)

    out = pl.pallas_call(
        kernel,
        out_shape=jax.ShapeDtypeStruct((1, 1), jnp.float32),
        grid=(num_tiles,),
        in_specs=[
            pl.BlockSpec(memory_space=pltpu.MemorySpace.SMEM),        # penalty_weight
            pl.BlockSpec((tr, _LANE), lambda i: (i, 0)),              # predictions
            pl.BlockSpec((tr, _LANE), lambda i: (i, 0)),              # targets
        ],
        out_specs=pl.BlockSpec(memory_space=pltpu.MemorySpace.SMEM),
        scratch_shapes=[
            pltpu.VMEM((tr, _LANE), jnp.float32),       # fused MSE / non-neg accumulator
            pltpu.VMEM((tr, _LANE - 1), jnp.float32),   # column-penalty accumulator
        ],
        compiler_params=pltpu.CompilerParams(
            dimension_semantics=("arbitrary",),
            vmem_limit_bytes=32 * 1024 * 1024,
        ),
        cost_estimate=pl.CostEstimate(
            flops=10 * n, transcendentals=0, bytes_accessed=bytes_accessed),
    )(pw_arr, pred2d, targ2d)
    return out[0, 0]


def wicket_loss_ref(predictions, targets, penalty_weight=1.0):
    """Pure-JAX reference mirroring the PyTorch forward."""
    mse_loss = jnp.mean((predictions - targets) ** 2)
    wickets_pred = predictions[:, 0]
    bonus_pred = predictions[:, 1]
    penalty = penalty_weight * jnp.mean(jax.nn.relu(bonus_pred - wickets_pred))
    zero_penalty = penalty_weight * jnp.mean(
        jax.nn.relu(-1.0 * wickets_pred * bonus_pred))
    non_negative_penalty = penalty_weight * jnp.mean(jax.nn.relu(-predictions))
    return (mse_loss * 2 + penalty * 1 + non_negative_penalty * 1
            + zero_penalty * 0.25)


if __name__ == "__main__":
    key = jax.random.PRNGKey(0)
    k1, k2, k3, k4 = jax.random.split(key, 4)

    # Small shape consistent with the module: batch of 8 predictions, 4 channels
    # (column 0 = wickets, column 1 = bonus).
    B, C = 8, 4
    predictions = jax.random.normal(k1, (B, C), dtype=jnp.float32)
    targets = jax.random.normal(k2, (B, C), dtype=jnp.float32)

    loss = wicket_loss(predictions, targets, penalty_weight=1.0)
    jax.block_until_ready(loss)
    ref = wicket_loss_ref(predictions, targets, penalty_weight=1.0)
    assert jnp.allclose(loss, ref, rtol=1e-5, atol=1e-5), (loss, ref)

    # Second check: multiple grid steps, ragged/padded tail, non-default weight.
    B2, C2 = 300, 4
    p2 = jax.random.normal(k3, (B2, C2), dtype=jnp.float32)
    t2 = jax.random.normal(k4, (B2, C2), dtype=jnp.float32)
    loss2 = wicket_loss(p2, t2, penalty_weight=0.5, block_rows=8)
    jax.block_until_ready(loss2)
    ref2 = wicket_loss_ref(p2, t2, penalty_weight=0.5)
    assert jnp.allclose(loss2, ref2, rtol=1e-5, atol=1e-5), (loss2, ref2)

    print("KERNEL_OK")
</pallas_src>

<mosaic_0001>
module attributes {stable_mosaic.version = 11 : i64} {
  func.func @_wicket_loss_kernel(%arg0: i32, %arg1: memref<1x1xf32, #tpu.memory_space<smem>>, %arg2: memref<1x128xf32, #tpu.memory_space<vmem>>, %arg3: memref<1x128xf32, #tpu.memory_space<vmem>>, %arg4: memref<1x1xf32, #tpu.memory_space<smem>>, %arg5: memref<1x128xf32, #tpu.memory_space<vmem>>, %arg6: memref<1x127xf32, #tpu.memory_space<vmem>>) attributes {dimension_semantics = [#tpu.dimension_semantics<arbitrary>], iteration_bounds = array<i64: 1>, scalar_prefetch = 0 : i64, scratch_operands = 2 : i64, tpu.core_type = #tpu.core_type<tc>, window_params = [{transform_indices = @transform_0, window_bounds = array<i64: 1, 1>}, {transform_indices = @transform_1, window_bounds = array<i64: 1, 128>}, {transform_indices = @transform_2, window_bounds = array<i64: 1, 128>}, {transform_indices = @transform_3, window_bounds = array<i64: 1, 1>}]} {
    %c0_i32 = arith.constant 0 : i32
    %0 = arith.cmpi eq, %arg0, %c0_i32 : i32
    %1 = arith.extui %0 : i1 to i32
    %c0_i32_0 = arith.constant 0 : i32
    %2 = arith.cmpi ne, %1, %c0_i32_0 : i32
    scf.if %2 {
      %cst_34 = arith.constant 0.000000e+00 : f32
      %81 = vector.broadcast %cst_34 : f32 to vector<1x128xf32>
      %c0_35 = arith.constant 0 : index
      %c0_36 = arith.constant 0 : index
      %82 = vector.load %arg5[%c0_35, %c0_36] : memref<1x128xf32, #tpu.memory_space<vmem>>, vector<1x128xf32>
      tpu.vector_store %arg5[%c0_35, %c0_36], %81 {strides = array<i32>} : memref<1x128xf32, #tpu.memory_space<vmem>>, vector<1x128xf32>,
      %cst_37 = arith.constant 0.000000e+00 : f32
      %83 = vector.broadcast %cst_37 : f32 to vector<1x127xf32>
      %c0_38 = arith.constant 0 : index
      %c0_39 = arith.constant 0 : index
      %84 = vector.load %arg6[%c0_38, %c0_39] : memref<1x127xf32, #tpu.memory_space<vmem>>, vector<1x127xf32>
      tpu.vector_store %arg6[%c0_38, %c0_39], %83 {strides = array<i32>} : memref<1x127xf32, #tpu.memory_space<vmem>>, vector<1x127xf32>,
    } else {
    }
    %c0 = arith.constant 0 : index
    %c0_1 = arith.constant 0 : index
    %3 = vector.load %arg2[%c0, %c0_1] : memref<1x128xf32, #tpu.memory_space<vmem>>, vector<1x128xf32>
    %c0_2 = arith.constant 0 : index
    %c0_3 = arith.constant 0 : index
    %4 = vector.load %arg3[%c0_2, %c0_3] : memref<1x128xf32, #tpu.memory_space<vmem>>, vector<1x128xf32>
    %c0_4 = arith.constant 0 : index
    %c0_5 = arith.constant 0 : index
    %5 = memref.load %arg1[%c0_4, %c0_5] : memref<1x1xf32, #tpu.memory_space<smem>>
    %6 = tpu.iota {dimensions = array<i32: 0>} : vector<1x128xi32>
    %c1_i32 = arith.constant 1 : i32
    %7 = arith.muli %arg0, %c1_i32 : i32
    %8 = vector.broadcast %7 : i32 to vector<1x128xi32>
    %9 = arith.addi %6, %8 : vector<1x128xi32>
    %10 = tpu.iota {dimensions = array<i32: 1>} : vector<1x128xi32>
    %c0_i32_6 = arith.constant 0 : i32
    %11 = vector.broadcast %c0_i32_6 : i32 to vector<1x128xi32>
    %12 = arith.cmpi slt, %9, %11 : vector<1x128xi32>
    %c0_i32_7 = arith.constant 0 : i32
    %13 = vector.broadcast %c0_i32_7 : i32 to vector<1x128xi32>
    %14 = arith.cmpi eq, %9, %13 : vector<1x128xi32>
    %c32_i32 = arith.constant 32 : i32
    %15 = vector.broadcast %c32_i32 : i32 to vector<1x128xi32>
    %16 = arith.cmpi slt, %10, %15 : vector<1x128xi32>
    %17 = arith.andi %14, %16 : vector<1x128xi1>
    %18 = arith.ori %12, %17 : vector<1x128xi1>
    %19 = arith.subf %3, %4 : vector<1x128xf32>
    %20 = arith.mulf %19, %19 : vector<1x128xf32>
    %cst = arith.constant 6.250000e-02 : f32
    %21 = vector.broadcast %cst : f32 to vector<1x128xf32>
    %22 = arith.mulf %21, %20 : vector<1x128xf32>
    %cst_8 = arith.constant 3.125000e-02 : f32
    %23 = arith.mulf %5, %cst_8 : f32
    %cst_9 = arith.constant 0.000000e+00 : f32
    %24 = vector.broadcast %cst_9 : f32 to vector<1x128xf32>
    %25 = arith.subf %24, %3 : vector<1x128xf32>
    %cst_10 = arith.constant 0.000000e+00 : f32
    %26 = vector.broadcast %cst_10 : f32 to vector<1x128xf32>
    %27 = arith.maximumf %25, %26 : vector<1x128xf32>
    %28 = vector.broadcast %23 : f32 to vector<1x128xf32>
    %29 = arith.mulf %28, %27 : vector<1x128xf32>
    %30 = arith.addf %22, %29 : vector<1x128xf32>
    %c0_11 = arith.constant 0 : index
    %c0_12 = arith.constant 0 : index
    %31 = vector.load %arg5[%c0_11, %c0_12] : memref<1x128xf32, #tpu.memory_space<vmem>>, vector<1x128xf32>
    %cst_13 = arith.constant 0.000000e+00 : f32
    %32 = vector.broadcast %cst_13 : f32 to vector<1x128xf32>
    %33 = arith.select %18, %30, %32 : vector<1x128xi1>, vector<1x128xf32>
    %34 = arith.addf %31, %33 : vector<1x128xf32>
    %c0_14 = arith.constant 0 : index
    %c0_15 = arith.constant 0 : index
    %35 = vector.load %arg5[%c0_14, %c0_15] : memref<1x128xf32, #tpu.memory_space<vmem>>, vector<1x128xf32>
    tpu.vector_store %arg5[%c0_14, %c0_15], %34 {strides = array<i32>} : memref<1x128xf32, #tpu.memory_space<vmem>>, vector<1x128xf32>,
    %36 = vector.extract_strided_slice %3 {offsets = [0, 0], sizes = [1, 127], strides = [1, 1]} : vector<1x128xf32> to vector<1x127xf32>
    %37 = vector.extract_strided_slice %3 {offsets = [0, 1], sizes = [1, 127], strides = [1, 1]} : vector<1x128xf32> to vector<1x127xf32>
    %38 = arith.subf %37, %36 : vector<1x127xf32>
    %cst_16 = arith.constant 0.000000e+00 : f32
    %39 = vector.broadcast %cst_16 : f32 to vector<1x127xf32>
    %40 = arith.maximumf %38, %39 : vector<1x127xf32>
    %cst_17 = arith.constant 0.000000e+00 : f32
    %41 = vector.broadcast %cst_17 : f32 to vector<1x127xf32>
    %42 = arith.subf %41, %36 : vector<1x127xf32>
    %43 = arith.mulf %42, %37 : vector<1x127xf32>
    %cst_18 = arith.constant 0.000000e+00 : f32
    %44 = vector.broadcast %cst_18 : f32 to vector<1x127xf32>
    %45 = arith.maximumf %43, %44 : vector<1x127xf32>
    %cst_19 = arith.constant 2.500000e-01 : f32
    %46 = vector.broadcast %cst_19 : f32 to vector<1x127xf32>
    %47 = arith.mulf %46, %45 : vector<1x127xf32>
    %48 = arith.addf %40, %47 : vector<1x127xf32>
    %49 = vector.extract_strided_slice %10 {offsets = [0, 0], sizes = [1, 127], strides = [1, 1]} : vector<1x128xi32> to vector<1x127xi32>
    %c4_i32 = arith.constant 4 : i32
    %c0_i32_20 = arith.constant 0 : i32
    %50 = arith.cmpi eq, %c4_i32, %c0_i32_20 : i32
    %c1_i32_21 = arith.constant 1 : i32
    %51 = arith.select %50, %c1_i32_21, %c4_i32 : i32
    %52 = vector.broadcast %51 : i32 to vector<1x127xi32>
    %53 = arith.remsi %49, %52 : vector<1x127xi32>
    %c0_i32_22 = arith.constant 0 : i32
    %54 = vector.broadcast %c0_i32_22 : i32 to vector<1x127xi32>
    %55 = arith.cmpi ne, %53, %54 : vector<1x127xi32>
    %c0_i32_23 = arith.constant 0 : i32
    %56 = vector.broadcast %c0_i32_23 : i32 to vector<1x127xi32>
    %57 = arith.cmpi slt, %53, %56 : vector<1x127xi32>
    %c0_i32_24 = arith.constant 0 : i32
    %58 = arith.cmpi slt, %51, %c0_i32_24 : i32
    %59 = vector.broadcast %58 : i1 to vector<1x127xi1>
    %60 = vector.broadcast %59 : vector<1x127xi1> to vector<1x127xi1>
    %61 = arith.xori %57, %60 : vector<1x127xi1>
    %62 = arith.andi %61, %55 : vector<1x127xi1>
    %63 = vector.broadcast %51 : i32 to vector<1x127xi32>
    %64 = arith.addi %53, %63 : vector<1x127xi32>
    %65 = arith.select %62, %64, %53 : vector<1x127xi1>, vector<1x127xi32>
    %c0_i32_25 = arith.constant 0 : i32
    %66 = vector.broadcast %c0_i32_25 : i32 to vector<1x127xi32>
    %67 = arith.cmpi eq, %65, %66 : vector<1x127xi32>
    %68 = vector.extract_strided_slice %18 {offsets = [0, 0], sizes = [1, 127], strides = [1, 1]} : vector<1x128xi1> to vector<1x127xi1>
    %69 = arith.andi %67, %68 : vector<1x127xi1>
    %c0_26 = arith.constant 0 : index
    %c0_27 = arith.constant 0 : index
    %70 = vector.load %arg6[%c0_26, %c0_27] : memref<1x127xf32, #tpu.memory_space<vmem>>, vector<1x127xf32>
    %cst_28 = arith.constant 1.250000e-01 : f32
    %71 = arith.mulf %5, %cst_28 : f32
    %72 = vector.broadcast %71 : f32 to vector<1x127xf32>
    %73 = arith.mulf %72, %48 : vector<1x127xf32>
    %cst_29 = arith.constant 0.000000e+00 : f32
    %74 = vector.broadcast %cst_29 : f32 to vector<1x127xf32>
    %75 = arith.select %69, %73, %74 : vector<1x127xi1>, vector<1x127xf32>
    %76 = arith.addf %70, %75 : vector<1x127xf32>
    %c0_30 = arith.constant 0 : index
    %c0_31 = arith.constant 0 : index
    %77 = vector.load %arg6[%c0_30, %c0_31] : memref<1x127xf32, #tpu.memory_space<vmem>>, vector<1x127xf32>
    tpu.vector_store %arg6[%c0_30, %c0_31], %76 {strides = array<i32>} : memref<1x127xf32, #tpu.memory_space<vmem>>, vector<1x127xf32>,
    %c0_i32_32 = arith.constant 0 : i32
    %78 = arith.cmpi eq, %arg0, %c0_i32_32 : i32
    %79 = arith.extui %78 : i1 to i32
    %c0_i32_33 = arith.constant 0 : i32
    %80 = arith.cmpi ne, %79, %c0_i32_33 : i32
    scf.if %80 {
      %c0_34 = arith.constant 0 : index
      %c0_35 = arith.constant 0 : index
      %81 = vector.load %arg5[%c0_34, %c0_35] : memref<1x128xf32, #tpu.memory_space<vmem>>, vector<1x128xf32>
      %82 = vector.shape_cast %81 : vector<1x128xf32> to vector<1x1x128xf32>
      %cst_36 = arith.constant dense<0.000000e+00> : vector<1xf32>
      %83 = vector.multi_reduction <add>, %82, %cst_36 [1, 2] : vector<1x1x128xf32> to vector<1xf32>
      %84 = vector.shape_cast %83 : vector<1xf32> to vector<1x1x1xf32>
      %85 = vector.extract %84[0, 0, 0] : f32 from vector<1x1x1xf32>
      %c0_37 = arith.constant 0 : index
      %c0_38 = arith.constant 0 : index
      %86 = vector.load %arg6[%c0_37, %c0_38] : memref<1x127xf32, #tpu.memory_space<vmem>>, vector<1x127xf32>
      %87 = vector.shape_cast %86 : vector<1x127xf32> to vector<1x1x127xf32>
      %cst_39 = arith.constant dense<0.000000e+00> : vector<1xf32>
      %88 = vector.multi_reduction <add>, %87, %cst_39 [1, 2] : vector<1x1x127xf32> to vector<1xf32>
      %89 = vector.shape_cast %88 : vector<1xf32> to vector<1x1x1xf32>
      %90 = vector.extract %89[0, 0, 0] : f32 from vector<1x1x1xf32>
      %91 = arith.addf %85, %90 : f32
      %c0_40 = arith.constant 0 : index
      %c0_41 = arith.constant 0 : index
      %92 = memref.load %arg4[%c0_40, %c0_41] : memref<1x1xf32, #tpu.memory_space<smem>>
      memref.store %91, %arg4[%c0_40, %c0_41] : memref<1x1xf32, #tpu.memory_space<smem>>
    } else {
    }
    return
  }
  func.func @transform_0(%arg0: i32) -> (i32, i32) {
    %c0_i32 = arith.constant 0 : i32
    %c0_i32_0 = arith.constant 0 : i32
    %c0_i32_1 = arith.constant 0 : i32
    return %c0_i32, %c0_i32_0 : i32, i32
  }
  func.func @transform_1(%arg0: i32) -> (i32, i32) {
    %c0_i32 = arith.constant 0 : i32
    %c0_i32_0 = arith.constant 0 : i32
    return %arg0, %c0_i32 : i32, i32
  }
  func.func @transform_2(%arg0: i32) -> (i32, i32) {
    %c0_i32 = arith.constant 0 : i32
    %c0_i32_0 = arith.constant 0 : i32
    return %arg0, %c0_i32 : i32, i32
  }
  func.func @transform_3(%arg0: i32) -> (i32, i32) {
    %c0_i32 = arith.constant 0 : i32
    %c0_i32_0 = arith.constant 0 : i32
    %c0_i32_1 = arith.constant 0 : i32
    return %c0_i32, %c0_i32_0 : i32, i32
  }
}

</mosaic_0001>

<bundles_post_ra>
// kernel: tpu_custom_call.1
= control target key start
LH: loop header
LB: loop body
LE: loop exit
PB: predicated region body
PF: predicated region fallthrough
CT: control target
= control target key end

     0   :  { %s160_s14 = smov 127   ;;  %s212_s0 = inlined_call_operand.<no memory space> [shape: f32[1,1], index: 0, kind: input, shape index: {}]   ;;  %s213_s1 = inlined_call_operand.vmem [shape: f32[1,128], index: 1, kind: input, shape index: {}]   ;;  %s214_s2 = inlined_call_operand.vmem [shape: f32[1,128], index: 2, kind: input, shape index: {}]   ;;  %s215_s3 = inlined_call_operand.hbm [shape: f32[1,1], index: 3, kind: output, shape index: {}]  }
   0x1   :  { %v23_v0 = vld [vmem:[%s213_s1] sm:$0x1] }
   0x2   :  { %56 = vrot.lane.b32.xlu0 %v23_v0, %s160_s14 }
   0x3   :  { %9 = vsyncpa [#allocation6], 0  ;;  %s161_s15 = smov 1   ;;  %v26_v1 = vlaneseq  ;;  %s40_s18 = smul.f32 0.03125, %s212_s0  ;;  %v24_v2 = vld [vmem:[%s214_s2] sm:$0x1] }
   0x4   :  { %v41_v5 = vsub.f32 0.0, %v23_v0  ;;  %v37_v7 = vsub.f32 %v23_v0, %v24_v2  ;;  %v162_v8 = vmov 0.0   ;;  %vm98_vm3 = vcmask 1040384   ;;  %s82_s21 = smul.f32 0.125, %s212_s0  ;;  %s128_s23 = sshll.u32 %s215_s3, 4  ;;  %s129_s23 = int_to_ptr.hbm [resolvable:$true] %s128_s23 }
   0x5   :  { %v27_v3 = vshrl.u32 %v26_v1, 7  ;;  %v31_v4 = vand.u32 127, %v26_v1  ;;  %v43_v6 = vstv %s40_s18  ;;  %20 = vst [vmem:[#allocation2] sm:$0x1] %v162_v8  ;;  %vm21_vm4 = vcmask 1032192   ;;  %s163_s27 = smov [#allocation5]  }
   0x6   :  { %v42_v9 = vmax.f32 %v41_v5, 0.0  ;;  %v38_v10 = vmul.f32 %v37_v7, %v37_v7  ;;  %v83_v27 = vstv %s82_s21  ;;  %22 = vst.msk [vmem:[#allocation3] sm:$0x1] %vm21_vm4, %v162_v8 }
   0x7   :  { %vm33_vm0 = vcmp.eq.s32.totalorder %v27_v3, 0  ;;  %vm34_vm1 = vcmp.lt.s32.totalorder %v31_v4, 32  ;;  %v71_v38 = vand.u32 3, %v31_v4 }
   0x8   :  { %v44_v11 = vmul.f32 %v43_v6, %v42_v9  ;;  %v39_v12 = vmul.f32 0.0625, %v38_v10  ;;  %vm194_vm2 = vmand %vm33_vm0, %vm34_vm1 }
   0x9   :  { %vm79_vm5 = vcmp.eq.s32.totalorder %v71_v38, 0 }
   0xa   :  { %51 = vrot.lane.b32.xlu0 %v23_v0, %s161_s15  ;;  %v45_v14 = vadd.f32 %v44_v11, %v39_v12  ;;  %vm80_vm6 = vmand %vm79_vm5, %vm194_vm2 }
   0xc   :  { %v46_v15 = vld [vmem:[#allocation2] sm:$0x1]  ;;  %v47_v16 = vsel %vm194_vm2, %v45_v14, 0.0 }
   0xd   :  { %v48_v17 = vadd.f32 %v47_v16, %v46_v15  ;;  %v81_v40 = vld [vmem:[#allocation3] sm:$0x1] }
   0xf   :  { %49 = vst [vmem:[#allocation2] sm:$0x1] %v48_v17 }
  0x16   :  { %v97_v22 = vld [vmem:[#allocation2] sm:$0x1] }
  0x17   :  { %v99_v23 = vsel %vm98_vm3, %v97_v22, 0.0 }
  0x18   :  { %100 = vadd.xlane.f32.xlu2 %v99_v23 }
  0x74   :  { %v57_v18 = vpop.permute.xlu0 %56 }
  0x75   :  { %v59_v19 = vmul.f32 %v57_v18, %v41_v5 }
  0x77   :  { %v60_v20 = vmax.f32 %v59_v19, 0.0 }
  0x79   :  { %v61_v21 = vmul.f32 0.25, %v60_v20 }
  0x7b   :  { %63 = vrot.lane.b32.xlu1 %v61_v21, %s161_s15 }
  0x7c   :  { %v52_v24 = vpop.permute.xlu0 %51 }
  0x7d   :  { %v54_v25 = vsub.f32 %v23_v0, %v52_v24 }
  0x7f   :  { %v55_v26 = vmax.f32 %v54_v25, 0.0 }
  0x8b   :  { %v101_v32 = vpop.xlane.xlu2 %100 }
  0x8c   :  { %v102_v33 = vrot.slane %v101_v32, 4 }
  0x8e   :  { %v103_v34 = vadd.f32 %v102_v33, %v101_v32 }
  0x90   :  { %v104_v35 = vrot.slane %v103_v34, 2 }
  0x92   :  { %v105_v36 = vadd.f32 %v104_v35, %v103_v34 }
  0x94   :  { %v106_v37 = vrot.slane %v105_v36, 1 }
  0x96   :  { %v107_v39 = vadd.f32 %v106_v37, %v105_v36 }
  0x98   :  { %138 = vpush %v107_v39 }
  0xc9   :  { %s139_s24 = spop %138 }
  0xed   :  { %v64_v28 = vpop.permute.xlu1 %63 }
  0xee   :  { %v66_v29 = vadd.f32 %v64_v28, %v55_v26 }
  0xf0   :  { %v84_v30 = vmul.f32 %v83_v27, %v66_v29 }
  0xf2   :  { %v86_v31 = vperm.slane %v84_v30, 0 }
  0xf4   :  { %87 = vrot.lane.b32.xlu1 %v86_v31, %s160_s14 }
 0x166   :  { %v88_v41 = vpop.permute.xlu1 %87 }
 0x167   :  { %v90_v42 = vsel %vm80_vm6, %v88_v41, 0.0 }
 0x168   :  { %v91_v43 = vadd.f32 %v90_v42, %v81_v40 }
 0x16a   :  { %93 = vst.msk [vmem:[#allocation3] sm:$0x1] %vm21_vm4, %v91_v43 }
 0x171   :  { %v109_v44 = vld [vmem:[#allocation3] sm:$0x1] }
 0x172   :  { %v110_v45 = vsel %vm21_vm4, %v109_v44, 0.0 }
 0x173   :  { %111 = vadd.xlane.f32.xlu2 %v110_v45 }
 0x1e6   :  { %v112_v46 = vpop.xlane.xlu2 %111 }
 0x1e7   :  { %v113_v47 = vrot.slane %v112_v46, 4 }
 0x1e9   :  { %v114_v48 = vadd.f32 %v113_v47, %v112_v46 }
 0x1eb   :  { %v115_v49 = vrot.slane %v114_v48, 2 }
 0x1ed   :  { %v116_v50 = vadd.f32 %v115_v49, %v114_v48 }
 0x1ef   :  { %v117_v51 = vrot.slane %v116_v50, 1 }
 0x1f1   :  { %v118_v52 = vadd.f32 %v117_v51, %v116_v50 }
 0x1f3   :  { %140 = vpush %v118_v52 }
 0x224   :  { %s141_s25 = spop %140 }
 0x225   :  { %s120_s26 = sadd.f32 %s141_s25, %s139_s24 }
 0x227   :  { %122 = sst [smem:[#allocation5]] %s120_s26 }
 0x228   :  { %131 = dma.smem_to_hbm %s163_s27, 16, %s129_s23, [#allocation6]  }
 0x229   :  { %158 = dma.done.wait [#allocation6], 16  }
 0x22a   :  { %159 = vsyncadd [#allocation6], 4294967280 }
 0x22b   :  { %136 = sfence }
 0x22c   :  { %137 = vsyncpa [#allocation6], 1 }

</bundles_post_ra>
